<compile_context>
chip_gen: v6e
topology: v6e:2x2x1
jax: 0.10.0
libtpu: 0.0.40
codegen_flags: <defaults>
</compile_context>

<pallas_src>
import functools

import jax
import jax.numpy as jnp
from jax.experimental import pallas as pl
from jax.experimental.pallas import tpu as pltpu


def _round_up(x, m):
    return (x + m - 1) // m * m


def _block_diag(block, p):
    """Block-diagonal repeat of `block` p times (built once at prepare time)."""
    if p == 1:
        return block
    r, c = block.shape
    out = jnp.zeros((p * r, p * c), block.dtype)
    for k in range(p):
        out = out.at[k * r:(k + 1) * r, k * c:(k + 1) * c].set(block)
    return out


# ---------------------------------------------------------------------------
# Kernels
# ---------------------------------------------------------------------------

def _layernorm_add_silu(h, ident, aff_ref, ones_ref):
    """LayerNorm (segmented, reductions on the MXU) + residual + SiLU, f32."""
    bd = aff_ref[0:1, :]
    gamma = aff_ref[1:2, :]
    beta = aff_ref[2:3, :]

    h = h + bd
    ones_m = ones_ref[...]                     # block-diag of 1/dim_out
    # Segmented mean via MXU; result is already lane-broadcast.
    mean = jnp.dot(h, ones_m, preferred_element_type=jnp.float32)
    cent = h - mean
    # Segmented biased variance via MXU (two-pass: no cancellation).
    var = jnp.dot(cent * cent, ones_m, preferred_element_type=jnp.float32)
    hn = cent * jax.lax.rsqrt(var + 1e-5)
    hn = hn * gamma + beta

    out = hn + ident
    return out * jax.nn.sigmoid(out)           # SiLU (sigmoid on EUP)


def _resblock_kernel_proj(x_ref, wd_ref, ws_ref, aff_ref, ones_ref, o_ref):
    """dim_in != dim_out: dense + skip projection (two lane-dense matmuls)."""
    x = x_ref[...]
    xm = x.astype(wd_ref.dtype)                # in-kernel cast (no extra HBM pass)
    h = jnp.dot(xm, wd_ref[...], preferred_element_type=jnp.float32)
    ident = jnp.dot(xm, ws_ref[...], preferred_element_type=jnp.float32)
    o_ref[...] = _layernorm_add_silu(h, ident, aff_ref, ones_ref).astype(o_ref.dtype)


def _resblock_kernel_identity(x_ref, wd_ref, aff_ref, ones_ref, o_ref):
    """dim_in == dim_out: identity skip (residual uses x as provided, exact)."""
    x = x_ref[...]
    h = jnp.dot(x.astype(wd_ref.dtype), wd_ref[...],
                preferred_element_type=jnp.float32)
    o_ref[...] = _layernorm_add_silu(h, x.astype(jnp.float32),
                                     aff_ref, ones_ref).astype(o_ref.dtype)


# ---------------------------------------------------------------------------
# Host-side wrappers
# ---------------------------------------------------------------------------

def prepare_resblock_params(params, *, matmul_dtype=None, pack=None):
    """One-time per-layer packing (hoisted out of the per-step forward).

    Returns (prepared_arrays, pack) where pack = logical rows per 128-lane
    physical row.  matmul_dtype (e.g. "bfloat16") casts only the weights; the
    activations are cast in-kernel, LayerNorm/SiLU stay f32.
    """
    dim_in, dim_out = params["wd"].shape
    if pack is None:
        pack = 128 // dim_out if (dim_out < 128 and 128 % dim_out == 0) else 1
    w_dtype = (jnp.dtype(matmul_dtype) if matmul_dtype is not None
               else params["wd"].dtype)

    prepared = {
        # block-diagonal weights: [pack*dim_in, pack*dim_out]
        "wd": _block_diag(params["wd"], pack).astype(w_dtype),
        # (3, pack*dim_out): bias / gamma / beta tiled along lanes (one DMA)
        "aff": jnp.stack([jnp.tile(params["bd"], pack),
                          jnp.tile(params["gamma"], pack),
                          jnp.tile(params["beta"], pack)],
                         axis=0).astype(jnp.float32),
        # block-diagonal (1/dim_out) matrix for segmented mean/var on the MXU
        "ones": _block_diag(
            jnp.full((dim_out, dim_out), 1.0 / dim_out, jnp.float32), pack),
    }
    if "ws" in params:
        prepared["ws"] = _block_diag(params["ws"], pack).astype(w_dtype)
    return prepared, pack


@functools.partial(jax.jit, static_argnames=("pack", "tile_n", "out_dtype"))
def resblock_forward(x, prepared, *, pack=1, tile_n=2048, out_dtype=None):
    """x: [N, dim_in].  prepared/pack: from prepare_resblock_params().

    tile_n: max rows (of the packed view) per grid step.  out_dtype: e.g.
    jnp.bfloat16 to halve output HBM traffic if the consumer tolerates it.
    """
    n, dim_in = x.shape
    d_p = prepared["aff"].shape[1]           # pack * dim_out
    dim_in_p = prepared["wd"].shape[0]       # pack * dim_in
    assert dim_in_p == pack * dim_in, "x width does not match prepared params"
    dim_out = d_p // pack
    has_skip = "ws" in prepared
    out_dtype = jnp.dtype(out_dtype) if out_dtype is not None else x.dtype

    # Minimal tail pad only when N is not a multiple of pack (<= 3 rows;
    # never hit for the usual even NeRF batch sizes).
    rem = (-n) % pack
    if rem:
        x = jnp.concatenate([x, jnp.zeros((rem, dim_in), x.dtype)], axis=0)
    n_rows = (n + rem) // pack
    x_p = x.reshape(n_rows, dim_in_p)        # free row-major re-view

    # Sublane-aligned batch tile (8 f32 / 16 bf16 / 32 int8-fp8).
    isz = jnp.dtype(x.dtype).itemsize
    sub = {4: 8, 2: 16, 1: 32}.get(isz, 8)
    tile = max(sub, min(_round_up(tile_n, sub), _round_up(n_rows, sub)))
    # Ragged last block: OOB reads are row-local garbage (rows independent),
    # OOB writes are masked by Pallas -> no jnp.pad, no output slice.
    grid = (pl.cdiv(n_rows, tile),)
    # Note for v7x: with 2 TensorCores an even step count >= 4 is ideal; for
    # large NeRF batches tile_n=2048 gives that automatically.

    in_specs = [pl.BlockSpec((tile, dim_in_p), lambda i: (i, 0)),
                pl.BlockSpec((dim_in_p, d_p), lambda i: (0, 0))]
    operands = [x_p, prepared["wd"]]
    if has_skip:
        in_specs.append(pl.BlockSpec((dim_in_p, d_p), lambda i: (0, 0)))
        operands.append(prepared["ws"])
    in_specs += [pl.BlockSpec((3, d_p), lambda i: (0, 0)),
                 pl.BlockSpec((d_p, d_p), lambda i: (0, 0))]
    operands += [prepared["aff"], prepared["ones"]]
    out_spec = pl.BlockSpec((tile, d_p), lambda i: (i, 0))

    kernel = _resblock_kernel_proj if has_skip else _resblock_kernel_identity

    w_bytes = jnp.dtype(prepared["wd"].dtype).itemsize
    o_bytes = jnp.dtype(out_dtype).itemsize
    n_w = 2 if has_skip else 1

    # Double-buffered tiles + broadcast operands + live f32 intermediates.
    vmem_needed = (2 * (tile * dim_in_p * isz + tile * d_p * o_bytes
                        + n_w * dim_in_p * d_p * w_bytes
                        + d_p * d_p * 4 + 8 * 128 * 4)
                   + 6 * tile * d_p * 4)
    # Cap well below v7x's 64 MiB physical VMEM (leave compiler headroom).
    vmem_limit = int(min(max(vmem_needed + (4 << 20), 32 << 20), 48 << 20))

    mm_flops = 2 * dim_in_p * d_p * n_w + 2 * 2 * d_p * d_p
    cost = pl.CostEstimate(
        flops=n_rows * (mm_flops + 12 * d_p),
        transcendentals=n_rows * 2 * d_p,     # sigmoid + rsqrt per element
        bytes_accessed=(n_rows * dim_in_p * isz
                        + n_w * dim_in_p * d_p * w_bytes
                        + d_p * d_p * 4 + 3 * d_p * 4
                        + n_rows * d_p * o_bytes),
    )

    y_p = pl.pallas_call(
        kernel,
        out_shape=jax.ShapeDtypeStruct((n_rows, d_p), out_dtype),
        grid=grid,
        in_specs=in_specs,
        out_specs=out_spec,
        compiler_params=pltpu.CompilerParams(
            dimension_semantics=("parallel",),
            vmem_limit_bytes=vmem_limit),
        cost_estimate=cost,
    )(*operands)

    y = y_p.reshape(n_rows * pack, dim_out)   # free re-view back to [N, dim_out]
    return y[:n] if rem else y


# ---------------------------------------------------------------------------
# Reference & demo
# ---------------------------------------------------------------------------

def init_resblock_params(key, dim_in, dim_out):
    """Synthetic init with nn.Linear / nn.LayerNorm shapes (W stored [in, out])."""
    k1, k2, k3 = jax.random.split(key, 3)
    bound = 1.0 / jnp.sqrt(dim_in)
    params = {
        "wd": jax.random.uniform(k1, (dim_in, dim_out), jnp.float32, -bound, bound),
        "bd": jax.random.uniform(k2, (dim_out,), jnp.float32, -bound, bound),
        "gamma": jnp.ones((dim_out,), jnp.float32),
        "beta": jnp.zeros((dim_out,), jnp.float32),
    }
    if dim_in != dim_out:
        params["ws"] = jax.random.uniform(k3, (dim_in, dim_out), jnp.float32,
                                          -bound, bound)
    return params


def resblock_reference(x, params):
    """Pure-JAX reference."""
    h = x @ params["wd"] + params["bd"]
    mean = jnp.mean(h, axis=-1, keepdims=True)
    var = jnp.mean((h - mean) ** 2, axis=-1, keepdims=True)
    hn = (h - mean) / jnp.sqrt(var + 1e-5)
    hn = hn * params["gamma"] + params["beta"]
    ident = x @ params["ws"] if "ws" in params else x
    out = hn + ident
    return out * jax.nn.sigmoid(out)


if __name__ == "__main__":
    key = jax.random.PRNGKey(0)
    kx1, kx2, kx3, kp1, kp2 = jax.random.split(key, 5)

    # Case 1: projection skip (dim_in != dim_out), lane-packed (P=2), f32.
    n1, dim_in, dim_out = 300, 32, 64
    x1 = jax.random.normal(kx1, (n1, dim_in), jnp.float32)
    params1 = init_resblock_params(kp1, dim_in, dim_out)
    prep1, pack1 = prepare_resblock_params(params1)
    y1 = resblock_forward(x1, prep1, pack=pack1)
    jax.block_until_ready(y1)
    y1_ref = resblock_reference(x1, params1)
    assert y1.shape == (n1, dim_out)
    assert jnp.allclose(y1, y1_ref, atol=1e-4, rtol=1e-4)

    # Case 2: identity skip (dim_in == dim_out), f32.
    n2 = 256
    x2 = jax.random.normal(kx2, (n2, dim_out), jnp.float32)
    params2 = init_resblock_params(kp2, dim_out, dim_out)
    prep2, pack2 = prepare_resblock_params(params2)
    y2 = resblock_forward(x2, prep2, pack=pack2)
    jax.block_until_ready(y2)
    assert jnp.allclose(y2, resblock_reference(x2, params2), atol=1e-4, rtol=1e-4)

    # Case 3: bf16 activations + weights (fast MXU path on v5e/v6e/v7x);
    # 160-row block over 150 packed rows exercises masked ragged writes.
    prep3, pack3 = prepare_resblock_params(params1, matmul_dtype="bfloat16")
    y3 = resblock_forward(x1.astype(jnp.bfloat16), prep3, pack=pack3)
    jax.block_until_ready(y3)
    assert jnp.allclose(y3.astype(jnp.float32), y1_ref, atol=5e-2, rtol=5e-2)

    # Case 4: multi-step grid with a ragged last block (no pad, no slice).
    n4 = 1000
    x4 = jax.random.normal(kx3, (n4, dim_in), jnp.float32)
    y4 = resblock_forward(x4, prep1, pack=pack1, tile_n=128)
    jax.block_until_ready(y4)
    assert jnp.allclose(y4, resblock_reference(x4, params1), atol=1e-4, rtol=1e-4)

    print("KERNEL_OK")
</pallas_src>

<mosaic_0001>
module attributes {stable_mosaic.version = 11 : i64} {
  func.func @_resblock_kernel_proj(%arg0: i32, %arg1: memref<152x64xf32, #tpu.memory_space<vmem>>, %arg2: memref<64x128xf32, #tpu.memory_space<vmem>>, %arg3: memref<64x128xf32, #tpu.memory_space<vmem>>, %arg4: memref<3x128xf32, #tpu.memory_space<vmem>>, %arg5: memref<128x128xf32, #tpu.memory_space<vmem>>, %arg6: memref<152x128xf32, #tpu.memory_space<vmem>>) attributes {dimension_semantics = [#tpu.dimension_semantics<parallel>], iteration_bounds = array<i64: 1>, scalar_prefetch = 0 : i64, scratch_operands = 0 : i64, tpu.core_type = #tpu.core_type<tc>, window_params = [{transform_indices = @transform_0, window_bounds = array<i64: 152, 64>}, {pipeline_mode = #tpu.pipeline_mode<synchronous>, transform_indices = @transform_1, window_bounds = array<i64: 64, 128>}, {pipeline_mode = #tpu.pipeline_mode<synchronous>, transform_indices = @transform_2, window_bounds = array<i64: 64, 128>}, {pipeline_mode = #tpu.pipeline_mode<synchronous>, transform_indices = @transform_3, window_bounds = array<i64: 3, 128>}, {pipeline_mode = #tpu.pipeline_mode<synchronous>, transform_indices = @transform_4, window_bounds = array<i64: 128, 128>}, {transform_indices = @transform_5, window_bounds = array<i64: 152, 128>}]} {
    %c0 = arith.constant 0 : index
    %c0_0 = arith.constant 0 : index
    %0 = vector.load %arg1[%c0, %c0_0] : memref<152x64xf32, #tpu.memory_space<vmem>>, vector<152x64xf32>
    %c0_1 = arith.constant 0 : index
    %c0_2 = arith.constant 0 : index
    %1 = vector.load %arg2[%c0_1, %c0_2] : memref<64x128xf32, #tpu.memory_space<vmem>>, vector<64x128xf32>
    %cst = arith.constant dense<0.000000e+00> : vector<152x128xf32>
    %2 = tpu.matmul %0, %1, %cst {dimension_numbers = #tpu.dot_dimension_numbers<[1], [0], [0], [1], [0, 0, 1, 1], [], []>} : vector<152x64xf32>, vector<64x128xf32>, vector<152x128xf32> -> vector<152x128xf32>
    %c0_3 = arith.constant 0 : index
    %c0_4 = arith.constant 0 : index
    %3 = vector.load %arg3[%c0_3, %c0_4] : memref<64x128xf32, #tpu.memory_space<vmem>>, vector<64x128xf32>
    %cst_5 = arith.constant dense<0.000000e+00> : vector<152x128xf32>
    %4 = tpu.matmul %0, %3, %cst_5 {dimension_numbers = #tpu.dot_dimension_numbers<[1], [0], [0], [1], [0, 0, 1, 1], [], []>} : vector<152x64xf32>, vector<64x128xf32>, vector<152x128xf32> -> vector<152x128xf32>
    %c0_6 = arith.constant 0 : index
    %c0_7 = arith.constant 0 : index
    %5 = vector.load %arg4[%c0_6, %c0_7] : memref<3x128xf32, #tpu.memory_space<vmem>>, vector<1x128xf32>
    %c1 = arith.constant 1 : index
    %c0_8 = arith.constant 0 : index
    %6 = vector.load %arg4[%c1, %c0_8] : memref<3x128xf32, #tpu.memory_space<vmem>>, vector<1x128xf32>
    %c2 = arith.constant 2 : index
    %c0_9 = arith.constant 0 : index
    %7 = vector.load %arg4[%c2, %c0_9] : memref<3x128xf32, #tpu.memory_space<vmem>>, vector<1x128xf32>
    %8 = vector.broadcast %5 : vector<1x128xf32> to vector<152x128xf32>
    %9 = arith.addf %2, %8 : vector<152x128xf32>
    %c0_10 = arith.constant 0 : index
    %c0_11 = arith.constant 0 : index
    %10 = vector.load %arg5[%c0_10, %c0_11] : memref<128x128xf32, #tpu.memory_space<vmem>>, vector<128x128xf32>
    %cst_12 = arith.constant dense<0.000000e+00> : vector<152x128xf32>
    %11 = tpu.matmul %9, %10, %cst_12 {dimension_numbers = #tpu.dot_dimension_numbers<[1], [0], [0], [1], [0, 0, 1, 1], [], []>} : vector<152x128xf32>, vector<128x128xf32>, vector<152x128xf32> -> vector<152x128xf32>
    %12 = arith.subf %9, %11 : vector<152x128xf32>
    %13 = arith.mulf %12, %12 : vector<152x128xf32>
    %cst_13 = arith.constant dense<0.000000e+00> : vector<152x128xf32>
    %14 = tpu.matmul %13, %10, %cst_13 {dimension_numbers = #tpu.dot_dimension_numbers<[1], [0], [0], [1], [0, 0, 1, 1], [], []>} : vector<152x128xf32>, vector<128x128xf32>, vector<152x128xf32> -> vector<152x128xf32>
    %cst_14 = arith.constant 9.99999974E-6 : f32
    %15 = vector.broadcast %cst_14 : f32 to vector<152x128xf32>
    %16 = arith.addf %14, %15 : vector<152x128xf32>
    %17 = math.rsqrt %16 : vector<152x128xf32>
    %18 = arith.mulf %12, %17 : vector<152x128xf32>
    %19 = vector.broadcast %6 : vector<1x128xf32> to vector<152x128xf32>
    %20 = arith.mulf %18, %19 : vector<152x128xf32>
    %21 = vector.broadcast %7 : vector<1x128xf32> to vector<152x128xf32>
    %22 = arith.addf %20, %21 : vector<152x128xf32>
    %23 = arith.addf %22, %4 : vector<152x128xf32>
    %24 = arith.negf %23 : vector<152x128xf32>
    %25 = math.exp %24 : vector<152x128xf32>
    %cst_15 = arith.constant 1.000000e+00 : f32
    %26 = vector.broadcast %cst_15 : f32 to vector<152x128xf32>
    %27 = arith.addf %26, %25 : vector<152x128xf32>
    %28 = arith.divf %26, %27 : vector<152x128xf32>
    %29 = arith.mulf %23, %28 : vector<152x128xf32>
    %c0_16 = arith.constant 0 : index
    %c0_17 = arith.constant 0 : index
    %30 = vector.load %arg6[%c0_16, %c0_17] : memref<152x128xf32, #tpu.memory_space<vmem>>, vector<152x128xf32>
    tpu.vector_store %arg6[%c0_16, %c0_17], %29 {strides = array<i32>} : memref<152x128xf32, #tpu.memory_space<vmem>>, vector<152x128xf32>,
    return
  }
  func.func @transform_0(%arg0: i32) -> (i32, i32) {
    %c0_i32 = arith.constant 0 : i32
    %c0_i32_0 = arith.constant 0 : i32
    return %arg0, %c0_i32 : i32, i32
  }
  func.func @transform_1(%arg0: i32) -> (i32, i32) {
    %c0_i32 = arith.constant 0 : i32
    %c0_i32_0 = arith.constant 0 : i32
    %c0_i32_1 = arith.constant 0 : i32
    return %c0_i32, %c0_i32_0 : i32, i32
  }
  func.func @transform_2(%arg0: i32) -> (i32, i32) {
    %c0_i32 = arith.constant 0 : i32
    %c0_i32_0 = arith.constant 0 : i32
    %c0_i32_1 = arith.constant 0 : i32
    return %c0_i32, %c0_i32_0 : i32, i32
  }
  func.func @transform_3(%arg0: i32) -> (i32, i32) {
    %c0_i32 = arith.constant 0 : i32
    %c0_i32_0 = arith.constant 0 : i32
    %c0_i32_1 = arith.constant 0 : i32
    return %c0_i32, %c0_i32_0 : i32, i32
  }
  func.func @transform_4(%arg0: i32) -> (i32, i32) {
    %c0_i32 = arith.constant 0 : i32
    %c0_i32_0 = arith.constant 0 : i32
    %c0_i32_1 = arith.constant 0 : i32
    return %c0_i32, %c0_i32_0 : i32, i32
  }
  func.func @transform_5(%arg0: i32) -> (i32, i32) {
    %c0_i32 = arith.constant 0 : i32
    %c0_i32_0 = arith.constant 0 : i32
    return %arg0, %c0_i32 : i32, i32
  }
}

</mosaic_0001>

<bundles_post_ra>
// kernel: resblock_forward.1
= control target key start
LH: loop header
LB: loop body
LE: loop exit
PB: predicated region body
PF: predicated region fallthrough
CT: control target
= control target key end

     0   :  { %v1697_v0 = vmov 0.0   ;;  %vm1698_vm0 = vmmov 0   ;;  %vm55_vm1 = vcmask 523264   ;;  %s2565_s1 = inlined_call_operand.vmem [shape: f32[64,128], index: 1, kind: input, shape index: {}]   ;;  %s2566_s2 = inlined_call_operand.vmem [shape: f32[64,128], index: 2, kind: input, shape index: {}]   ;;  %s2567_s0 = inlined_call_operand.vmem [shape: f32[150,64], index: 0, kind: input, shape index: {}]   ;;  %s2568_s4 = inlined_call_operand.vmem [shape: f32[128,128], index: 4, kind: input, shape index: {}]   ;;  %s2569_s3 = inlined_call_operand.vmem [shape: f32[3,128], index: 3, kind: input, shape index: {}]   ;;  %s2570_s5 = inlined_call_operand.vmem [shape: f32[150,128], index: 5, kind: output, shape index: {}]  }
   0x1   :  { %1330 = vmatprep.subr.mxu1 %v1697_v0  ;;  %v46_v1 = vld [vmem:[%s2565_s1 + $0x38] sm:$0xff]  ;;  %v45_v2 = vld [vmem:[%s2565_s1 + $0x30] sm:$0xff]  ;;  %1346 = vmatprep.mubr.msk.f32.mxu1 %vm1698_vm0, %v1697_v0  ;;  %v44_v3 = vld [vmem:[%s2565_s1 + $0x28] sm:$0xff] }
   0x2   :  { %1331 = vmatpush3.msra.mxu1 %v46_v1  ;;  %1257 = vmatprep.subr.mxu0 %v1697_v0  ;;  %v43_v4 = vld [vmem:[%s2565_s1 + $0x20] sm:$0xff]  ;;  %v42_v5 = vld [vmem:[%s2565_s1 + $0x18] sm:$0xff]  ;;  %v41_v6 = vld [vmem:[%s2565_s1 + $0x10] sm:$0xff] }
   0x3   :  { %1332 = vmatprep.subr.mxu1 %v1697_v0  ;;  %1273 = vmatprep.mubr.msk.f32.mxu0 %vm1698_vm0, %v1697_v0  ;;  %v54_v7 = vld [vmem:[%s2566_s2 + $0x38] sm:$0xff]  ;;  %v53_v8 = vld [vmem:[%s2566_s2 + $0x30] sm:$0xff]  ;;  %v40_v9 = vld [vmem:[%s2565_s1 + $0x8] sm:$0xff] }
   0x4   :  { %1333 = vmatpush3.msra.mxu1 %v45_v2  ;;  %1258 = vmatpush3.msra.mxu0 %v54_v7  ;;  %v52_v10 = vld [vmem:[%s2566_s2 + $0x28] sm:$0xff]  ;;  %v39_v11 = vld [vmem:[%s2565_s1] sm:$0xff]  ;;  %v50_v14 = vld [vmem:[%s2566_s2 + $0x18] sm:$0xff] }
   0x5   :  { %1334 = vmatprep.subr.mxu1 %v1697_v0  ;;  %1259 = vmatprep.subr.mxu0 %v1697_v0  ;;  %v20_v12 = vld [vmem:[%s2567_s0] sm:$0xff]  ;;  %v21_v15 = vld [vmem:[%s2567_s0 + $0x8] sm:$0xff]  ;;  %v49_v16 = vld [vmem:[%s2566_s2 + $0x10] sm:$0xff] }
   0x6   :  { %1335 = vmatpush3.msra.mxu1 %v44_v3  ;;  %1260 = vmatpush3.msra.mxu0 %v53_v8  ;;  %v51_v13 = vld [vmem:[%s2566_s2 + $0x20] sm:$0xff]  ;;  %v455_v17 = vld [vmem:[%s2568_s4 + $0x78] sm:$0xff]  ;;  %v48_v18 = vld [vmem:[%s2566_s2 + $0x8] sm:$0xff] }
   0x7   :  { %1336 = vmatprep.subr.mxu1 %v1697_v0  ;;  %1261 = vmatprep.subr.mxu0 %v1697_v0  ;;  %v22_v19 = vld [vmem:[%s2567_s0 + $0x10] sm:$0xff]  ;;  %v47_v20 = vld [vmem:[%s2566_s2] sm:$0xff]  ;;  %v23_v22 = vld [vmem:[%s2567_s0 + $0x18] sm:$0xff] }
   0x8   :  { %1337 = vmatpush3.msra.mxu1 %v43_v4  ;;  %1262 = vmatpush3.msra.mxu0 %v52_v10  ;;  %v454_v21 = vld [vmem:[%s2568_s4 + $0x70] sm:$0xff]  ;;  %v24_v23 = vld [vmem:[%s2567_s0 + $0x20] sm:$0xff]  ;;  %v453_v24 = vld [vmem:[%s2568_s4 + $0x68] sm:$0xff] }
   0x9   :  { %1338 = vmatprep.subr.mxu1 %v1697_v0  ;;  %1263 = vmatprep.subr.mxu0 %v1697_v0  ;;  %v452_v25 = vld [vmem:[%s2568_s4 + $0x60] sm:$0xff]  ;;  %v25_v26 = vld [vmem:[%s2567_s0 + $0x28] sm:$0xff]  ;;  %v451_v27 = vld [vmem:[%s2568_s4 + $0x58] sm:$0xff] }
   0xa   :  { %1339 = vmatpush3.msra.mxu1 %v42_v5  ;;  %1264 = vmatpush3.msra.mxu0 %v51_v13  ;;  %v26_v28 = vld [vmem:[%s2567_s0 + $0x30] sm:$0xff]  ;;  %v449_v30 = vld [vmem:[%s2568_s4 + $0x48] sm:$0xff]  ;;  %v27_v31 = vld [vmem:[%s2567_s0 + $0x38] sm:$0xff] }
   0xb   :  { %1340 = vmatprep.subr.mxu1 %v1697_v0  ;;  %1265 = vmatprep.subr.mxu0 %v1697_v0  ;;  %v450_v29 = vld [vmem:[%s2568_s4 + $0x50] sm:$0xff]  ;;  %v1892_v32 = vld [vmem:[%s2568_s4 + $0x40] sm:$0xff]  ;;  %v1906_v34 = vld [vmem:[%s2568_s4 + $0x38] sm:$0xff] }
   0xc   :  { %1341 = vmatpush3.msra.mxu1 %v41_v6  ;;  %1266 = vmatpush3.msra.mxu0 %v50_v14  ;;  %v28_v33 = vld [vmem:[%s2567_s0 + $0x40] sm:$0xff]  ;;  %v1917_v35 = vld [vmem:[%s2568_s4 + $0x30] sm:$0xff]  ;;  %v29_v36 = vld [vmem:[%s2567_s0 + $0x48] sm:$0xff] }
   0xd   :  { %1342 = vmatprep.subr.mxu1 %v1697_v0  ;;  %1267 = vmatprep.subr.mxu0 %v1697_v0  ;;  %v1932_v37 = vld [vmem:[%s2568_s4 + $0x28] sm:$0xff]  ;;  %v30_v38 = vld [vmem:[%s2567_s0 + $0x50] sm:$0xff]  ;;  %v1946_v39 = vld [vmem:[%s2568_s4 + $0x20] sm:$0xff] }
   0xe   :  { %1343 = vmatpush3.msra.mxu1 %v40_v9  ;;  %1268 = vmatpush3.msra.mxu0 %v49_v16  ;;  %v1957_v40 = vld [vmem:[%s2568_s4 + $0x18] sm:$0xff]  ;;  %v442_v42 = vld [vmem:[%s2568_s4 + $0x10] sm:$0xff]  ;;  %v32_v43 = vld [vmem:[%s2567_s0 + $0x60] sm:$0xff] }
   0xf   :  { %1344 = vmatprep.subr.mxu1 %v1697_v0  ;;  %1269 = vmatprep.subr.mxu0 %v1697_v0  ;;  %v31_v41 = vld [vmem:[%s2567_s0 + $0x58] sm:$0xff]  ;;  %v441_v44 = vld [vmem:[%s2568_s4 + $0x8] sm:$0xff]  ;;  %v440_v45 = vld [vmem:[%s2568_s4] sm:$0xff] }
  0x10   :  { %1345 = vmatpush3.msra.mxu1 %v39_v11  ;;  %1270 = vmatpush3.msra.mxu0 %v48_v18  ;;  %v33_v46 = vld [vmem:[%s2567_s0 + $0x68] sm:$0xff]  ;;  %v34_v47 = vld [vmem:[%s2567_s0 + $0x70] sm:$0xff]  ;;  %v35_v48 = vld [vmem:[%s2567_s0 + $0x78] sm:$0xff] }
  0x11   :  { %1347 = vmatmul.mubr.msk.f32.vlgmr.msra.gmra.mxu1 %vm55_vm1, %v20_v12  ;;  %1492 = vmatprep.subr.mxu1 %v1697_v0  ;;  %v36_v49 = vld [vmem:[%s2567_s0 + $0x80] sm:$0xff]  ;;  %v37_v50 = vld [vmem:[%s2567_s0 + $0x88] sm:$0xff]  ;;  %v38_v51 = vld [vmem:[%s2567_s0 + $0x90] sm:$0xff] }
  0x12   :  { %1349 = vmatprep.mubr.msk.f32.mxu1 %vm1698_vm0, %v1697_v0  ;;  %1493 = vmatpush3.msra.mxu1 %v455_v17  ;;  %v2075_v52 = vld [vmem:[%s2569_s3] ss:$0 sm:$0xff] }
  0x13   :  { %1494 = vmatprep.subr.mxu1 %v1697_v0  ;;  %1271 = vmatprep.subr.mxu0 %v1697_v0 }
  0x14   :  { %1495 = vmatpush3.msra.mxu1 %v454_v21  ;;  %1272 = vmatpush3.msra.mxu0 %v47_v20 }
  0x15   :  { %1350 = vmatmul.mubr.msk.f32.gmra.mxu1 %vm55_vm1, %v21_v15  ;;  %1274 = vmatmul.mubr.msk.f32.vlgmr.msra.gmra.mxu0 %vm55_vm1, %v20_v12 }
  0x16   :  { %1352 = vmatprep.mubr.msk.f32.mxu1 %vm1698_vm0, %v1697_v0  ;;  %1403 = vmatprep.subr.mxu0 %v1697_v0 }
  0x17   :  { %1276 = vmatprep.mubr.msk.f32.mxu0 %vm1698_vm0, %v1697_v0  ;;  %1404 = vmatpush3.msra.mxu0 %v455_v17 }
  0x18   :  { %1496 = vmatprep.subr.mxu1 %v1697_v0  ;;  %1405 = vmatprep.subr.mxu0 %v1697_v0 }
  0x19   :  { %1353 = vmatmul.mubr.msk.f32.gmra.mxu1 %vm55_vm1, %v22_v19  ;;  %1277 = vmatmul.mubr.msk.f32.gmra.mxu0 %vm55_vm1, %v21_v15 }
  0x1a   :  { %1355 = vmatprep.mubr.msk.f32.mxu1 %vm1698_vm0, %v1697_v0  ;;  %1279 = vmatprep.mubr.msk.f32.mxu0 %vm1698_vm0, %v1697_v0 }
  0x1b   :  { %1406 = vmatpush3.msra.mxu0 %v454_v21  ;;  %1497 = vmatpush3.msra.mxu1 %v453_v24 }
  0x1c   :  { %1407 = vmatprep.subr.mxu0 %v1697_v0  ;;  %1498 = vmatprep.subr.mxu1 %v1697_v0 }
  0x1d   :  { %1356 = vmatmul.mubr.msk.f32.gmra.mxu1 %vm55_vm1, %v23_v22  ;;  %1408 = vmatpush3.msra.mxu0 %v453_v24 }
  0x1e   :  { %1358 = vmatprep.mubr.msk.f32.mxu1 %vm1698_vm0, %v1697_v0  ;;  %1280 = vmatmul.mubr.msk.f32.gmra.mxu0 %vm55_vm1, %v22_v19 }
  0x1f   :  { %1282 = vmatprep.mubr.msk.f32.mxu0 %vm1698_vm0, %v1697_v0  ;;  %1409 = vmatprep.subr.mxu0 %v1697_v0 }
  0x20   :  { %1410 = vmatpush3.msra.mxu0 %v452_v25  ;;  %1499 = vmatpush3.msra.mxu1 %v452_v25 }
  0x21   :  { %1359 = vmatmul.mubr.msk.f32.gmra.mxu1 %vm55_vm1, %v24_v23  ;;  %1411 = vmatprep.subr.mxu0 %v1697_v0 }
  0x22   :  { %1361 = vmatprep.mubr.msk.f32.mxu1 %vm1698_vm0, %v1697_v0  ;;  %1283 = vmatmul.mubr.msk.f32.gmra.mxu0 %vm55_vm1, %v23_v22 }
  0x23   :  { %1285 = vmatprep.mubr.msk.f32.mxu0 %vm1698_vm0, %v1697_v0  ;;  %1412 = vmatpush3.msra.mxu0 %v451_v27 }
  0x24   :  { %1413 = vmatprep.subr.mxu0 %v1697_v0  ;;  %1500 = vmatprep.subr.mxu1 %v1697_v0 }
  0x25   :  { %1362 = vmatmul.mubr.msk.f32.gmra.mxu1 %vm55_vm1, %v25_v26  ;;  %1414 = vmatpush3.msra.mxu0 %v450_v29 }
  0x26   :  { %1364 = vmatprep.mubr.msk.f32.mxu1 %vm1698_vm0, %v1697_v0  ;;  %1286 = vmatmul.mubr.msk.f32.gmra.mxu0 %vm55_vm1, %v24_v23 }
  0x27   :  { %1288 = vmatprep.mubr.msk.f32.mxu0 %vm1698_vm0, %v1697_v0  ;;  %1415 = vmatprep.subr.mxu0 %v1697_v0 }
  0x28   :  { %1416 = vmatpush3.msra.mxu0 %v449_v30  ;;  %1501 = vmatpush3.msra.mxu1 %v451_v27 }
  0x29   :  { %1365 = vmatmul.mubr.msk.f32.gmra.mxu1 %vm55_vm1, %v26_v28  ;;  %1417 = vmatprep.subr.mxu0 %v1697_v0 }
  0x2a   :  { %1367 = vmatprep.mubr.msk.f32.mxu1 %vm1698_vm0, %v1697_v0  ;;  %1289 = vmatmul.mubr.msk.f32.gmra.mxu0 %vm55_vm1, %v25_v26 }
  0x2b   :  { %1291 = vmatprep.mubr.msk.f32.mxu0 %vm1698_vm0, %v1697_v0  ;;  %1418 = vmatpush3.msra.mxu0 %v1892_v32 }
  0x2c   :  { %1419 = vmatprep.subr.mxu0 %v1697_v0  ;;  %1502 = vmatprep.subr.mxu1 %v1697_v0 }
  0x2d   :  { %1368 = vmatmul.mubr.msk.f32.gmra.mxu1 %vm55_vm1, %v27_v31  ;;  %1420 = vmatpush3.msra.mxu0 %v1906_v34 }
  0x2e   :  { %1370 = vmatprep.mubr.msk.f32.mxu1 %vm1698_vm0, %v1697_v0  ;;  %1292 = vmatmul.mubr.msk.f32.gmra.mxu0 %vm55_vm1, %v26_v28 }
  0x2f   :  { %1294 = vmatprep.mubr.msk.f32.mxu0 %vm1698_vm0, %v1697_v0  ;;  %1421 = vmatprep.subr.mxu0 %v1697_v0 }
  0x30   :  { %1422 = vmatpush3.msra.mxu0 %v1917_v35  ;;  %1503 = vmatpush3.msra.mxu1 %v450_v29 }
  0x31   :  { %1371 = vmatmul.mubr.msk.f32.gmra.mxu1 %vm55_vm1, %v28_v33  ;;  %1423 = vmatprep.subr.mxu0 %v1697_v0 }
  0x32   :  { %1373 = vmatprep.mubr.msk.f32.mxu1 %vm1698_vm0, %v1697_v0  ;;  %1295 = vmatmul.mubr.msk.f32.gmra.mxu0 %vm55_vm1, %v27_v31 }
  0x33   :  { %1297 = vmatprep.mubr.msk.f32.mxu0 %vm1698_vm0, %v1697_v0  ;;  %1424 = vmatpush3.msra.mxu0 %v1932_v37 }
  0x34   :  { %1425 = vmatprep.subr.mxu0 %v1697_v0  ;;  %1504 = vmatprep.subr.mxu1 %v1697_v0 }
  0x35   :  { %1374 = vmatmul.mubr.msk.f32.gmra.mxu1 %vm55_vm1, %v29_v36  ;;  %1426 = vmatpush3.msra.mxu0 %v1946_v39 }
  0x36   :  { %1376 = vmatprep.mubr.msk.f32.mxu1 %vm1698_vm0, %v1697_v0  ;;  %1298 = vmatmul.mubr.msk.f32.gmra.mxu0 %vm55_vm1, %v28_v33 }
  0x37   :  { %1300 = vmatprep.mubr.msk.f32.mxu0 %vm1698_vm0, %v1697_v0  ;;  %1427 = vmatprep.subr.mxu0 %v1697_v0 }
  0x38   :  { %1428 = vmatpush3.msra.mxu0 %v1957_v40  ;;  %1505 = vmatpush3.msra.mxu1 %v449_v30 }
  0x39   :  { %1377 = vmatmul.mubr.msk.f32.gmra.mxu1 %vm55_vm1, %v30_v38  ;;  %1429 = vmatprep.subr.mxu0 %v1697_v0 }
  0x3a   :  { %1379 = vmatprep.mubr.msk.f32.mxu1 %vm1698_vm0, %v1697_v0  ;;  %1301 = vmatmul.mubr.msk.f32.gmra.mxu0 %vm55_vm1, %v29_v36 }
  0x3b   :  { %1303 = vmatprep.mubr.msk.f32.mxu0 %vm1698_vm0, %v1697_v0  ;;  %1430 = vmatpush3.msra.mxu0 %v442_v42 }
  0x3c   :  { %1431 = vmatprep.subr.mxu0 %v1697_v0  ;;  %1506 = vmatprep.subr.mxu1 %v1697_v0 }
  0x3d   :  { %1380 = vmatmul.mubr.msk.f32.gmra.mxu1 %vm55_vm1, %v31_v41  ;;  %1432 = vmatpush3.msra.mxu0 %v441_v44 }
  0x3e   :  { %1382 = vmatprep.mubr.msk.f32.mxu1 %vm1698_vm0, %v1697_v0  ;;  %1304 = vmatmul.mubr.msk.f32.gmra.mxu0 %vm55_vm1, %v30_v38 }
  0x3f   :  { %1306 = vmatprep.mubr.msk.f32.mxu0 %vm1698_vm0, %v1697_v0  ;;  %1433 = vmatprep.subr.mxu0 %v1697_v0 }
  0x40   :  { %1434 = vmatpush3.msra.mxu0 %v440_v45  ;;  %1507 = vmatpush3.msra.mxu1 %v1892_v32 }
  0x41   :  { %1383 = vmatmul.mubr.msk.f32.gmra.mxu1 %vm55_vm1, %v32_v43  ;;  %1508 = vmatprep.subr.mxu1 %v1697_v0 }
  0x42   :  { %1385 = vmatprep.mubr.msk.f32.mxu1 %vm1698_vm0, %v1697_v0  ;;  %1307 = vmatmul.mubr.msk.f32.gmra.mxu0 %vm55_vm1, %v31_v41 }
  0x43   :  { %1309 = vmatprep.mubr.msk.f32.mxu0 %vm1698_vm0, %v1697_v0  ;;  %1509 = vmatpush3.msra.mxu1 %v1906_v34 }
  0x44   :  { %1510 = vmatprep.subr.mxu1 %v1697_v0 }
  0x45   :  { %1386 = vmatmul.mubr.msk.f32.gmra.mxu1 %vm55_vm1, %v33_v46 }
  0x46   :  { %1388 = vmatprep.mubr.msk.f32.mxu1 %vm1698_vm0, %v1697_v0  ;;  %1310 = vmatmul.mubr.msk.f32.gmra.mxu0 %vm55_vm1, %v32_v43 }
  0x47   :  { %1312 = vmatprep.mubr.msk.f32.mxu0 %vm1698_vm0, %v1697_v0  ;;  %1511 = vmatpush3.msra.mxu1 %v1917_v35 }
  0x48   :  { %1512 = vmatprep.subr.mxu1 %v1697_v0 }
  0x49   :  { %1389 = vmatmul.mubr.msk.f32.gmra.mxu1 %vm55_vm1, %v34_v47 }
  0x4a   :  { %1391 = vmatprep.mubr.msk.f32.mxu1 %vm1698_vm0, %v1697_v0  ;;  %1313 = vmatmul.mubr.msk.f32.gmra.mxu0 %vm55_vm1, %v33_v46 }
  0x4b   :  { %1315 = vmatprep.mubr.msk.f32.mxu0 %vm1698_vm0, %v1697_v0  ;;  %1513 = vmatpush3.msra.mxu1 %v1932_v37 }
  0x4c   :  { %1514 = vmatprep.subr.mxu1 %v1697_v0 }
  0x4d   :  { %1392 = vmatmul.mubr.msk.f32.gmra.mxu1 %vm55_vm1, %v35_v48 }
  0x4e   :  { %1394 = vmatprep.mubr.msk.f32.mxu1 %vm1698_vm0, %v1697_v0  ;;  %1316 = vmatmul.mubr.msk.f32.gmra.mxu0 %vm55_vm1, %v34_v47 }
  0x4f   :  { %1318 = vmatprep.mubr.msk.f32.mxu0 %vm1698_vm0, %v1697_v0  ;;  %1515 = vmatpush3.msra.mxu1 %v1946_v39 }
  0x50   :  { %1516 = vmatprep.subr.mxu1 %v1697_v0 }
  0x51   :  { %1395 = vmatmul.mubr.msk.f32.gmra.mxu1 %vm55_vm1, %v36_v49 }
  0x52   :  { %1397 = vmatprep.mubr.msk.f32.mxu1 %vm1698_vm0, %v1697_v0  ;;  %1319 = vmatmul.mubr.msk.f32.gmra.mxu0 %vm55_vm1, %v35_v48 }
  0x53   :  { %1321 = vmatprep.mubr.msk.f32.mxu0 %vm1698_vm0, %v1697_v0  ;;  %1517 = vmatpush3.msra.mxu1 %v1957_v40 }
  0x54   :  { %1518 = vmatprep.subr.mxu1 %v1697_v0 }
  0x55   :  { %1398 = vmatmul.mubr.msk.f32.gmra.mxu1 %vm55_vm1, %v37_v50 }
  0x56   :  { %1400 = vmatprep.mubr.msk.f32.mxu1 %vm1698_vm0, %v1697_v0  ;;  %1322 = vmatmul.mubr.msk.f32.gmra.mxu0 %vm55_vm1, %v36_v49 }
  0x57   :  { %1324 = vmatprep.mubr.msk.f32.mxu0 %vm1698_vm0, %v1697_v0  ;;  %1519 = vmatpush3.msra.mxu1 %v442_v42 }
  0x58   :  { %1520 = vmatprep.subr.mxu1 %v1697_v0 }
  0x59   :  { %1401 = vmatmul.mubr.msk.f32.gmra.mxu1 %vm55_vm1, %v38_v51 }
  0x5a   :  { %1524 = vmatprep.mubr.msk.f32.mxu1 %vm1698_vm0, %v1697_v0  ;;  %1325 = vmatmul.mubr.msk.f32.gmra.mxu0 %vm55_vm1, %v37_v50 }
  0x5b   :  { %1521 = vmatpush3.msra.mxu1 %v441_v44  ;;  %1327 = vmatprep.mubr.msk.f32.mxu0 %vm1698_vm0, %v1697_v0 }
  0x5c   :  { %1522 = vmatprep.subr.mxu1 %v1697_v0 }
  0x5d   :  { %1523 = vmatpush3.msra.mxu1 %v440_v45 }
  0x5e   :  { %1328 = vmatmul.mubr.msk.f32.gmra.mxu0 %vm55_vm1, %v38_v51 }
  0x5f   :  { %1435 = vmatprep.mubr.msk.f32.mxu0 %vm1698_vm0, %v1697_v0 }
  0xd1   :  { %v346_v53 = vpop.f32.mrf.mxu1 }
  0xd2   :  { %v2078_v54 = vadd.f32 %v2075_v52, %v346_v53 }
  0xd3   :  { %v1348_v55 = vpop.f32.mrf.mxu1 }
  0xd4   :  { %1436 = vmatmul.mubr.f32.vlgmr.msra.gmra.mxu0 %v2078_v54 }
  0xd5   :  { %v351_v56 = vpop.f32.mrf.mxu1  ;;  %1438 = vmatprep.mubr.msk.f32.mxu0 %vm1698_vm0, %v1697_v0  ;;  %v2092_v61 = vpop.f32.mrf.mxu0 }
  0xd6   :  { %v2084_v57 = vadd.f32 %v2075_v52, %v351_v56 }
  0xd7   :  { %v1351_v58 = vpop.f32.mrf.mxu1  ;;  %v1275_v63 = vpop.f32.mrf.mxu0 }
  0xd8   :  { %1439 = vmatmul.mubr.f32.gmra.mxu0 %v2084_v57 }
  0xd9   :  { %v356_v59 = vpop.f32.mrf.mxu1  ;;  %1441 = vmatprep.mubr.msk.f32.mxu0 %vm1698_vm0, %v1697_v0  ;;  %v2100_v3 = vpop.f32.mrf.mxu0 }
  0xda   :  { %v2090_v60 = vadd.f32 %v2075_v52, %v356_v59 }
  0xdb   :  { %v1354_v62 = vpop.f32.mrf.mxu1  ;;  %v1278_v5 = vpop.f32.mrf.mxu0 }
  0xdc   :  { %1442 = vmatmul.mubr.f32.gmra.mxu0 %v2090_v60 }
  0xdd   :  { %v361_v1 = vpop.f32.mrf.mxu1  ;;  %1444 = vmatprep.mubr.msk.f32.mxu0 %vm1698_vm0, %v1697_v0 }
  0xde   :  { %v2098_v2 = vadd.f32 %v2075_v52, %v361_v1  ;;  %v2108_v8 = vpop.f32.mrf.mxu0 }
  0xdf   :  { %v1357_v4 = vpop.f32.mrf.mxu1 }
  0xe0   :  { %1445 = vmatmul.mubr.f32.gmra.mxu0 %v2098_v2  ;;  %v1281_v10 = vpop.f32.mrf.mxu0 }
  0xe1   :  { %v366_v6 = vpop.f32.mrf.mxu1  ;;  %1447 = vmatprep.mubr.msk.f32.mxu0 %vm1698_vm0, %v1697_v0 }
  0xe2   :  { %v2106_v7 = vadd.f32 %v2075_v52, %v366_v6  ;;  %v2116_v13 = vpop.f32.mrf.mxu0 }
  0xe3   :  { %v1360_v9 = vpop.f32.mrf.mxu1 }
  0xe4   :  { %1448 = vmatmul.mubr.f32.gmra.mxu0 %v2106_v7  ;;  %v1284_v15 = vpop.f32.mrf.mxu0 }
  0xe5   :  { %v371_v11 = vpop.f32.mrf.mxu1  ;;  %1450 = vmatprep.mubr.msk.f32.mxu0 %vm1698_vm0, %v1697_v0 }
  0xe6   :  { %v2114_v12 = vadd.f32 %v2075_v52, %v371_v11  ;;  %v2124_v18 = vpop.f32.mrf.mxu0 }
  0xe7   :  { %v1363_v14 = vpop.f32.mrf.mxu1 }
  0xe8   :  { %1451 = vmatmul.mubr.f32.gmra.mxu0 %v2114_v12  ;;  %v1287_v20 = vpop.f32.mrf.mxu0 }
  0xe9   :  { %v376_v16 = vpop.f32.mrf.mxu1  ;;  %1453 = vmatprep.mubr.msk.f32.mxu0 %vm1698_vm0, %v1697_v0 }
  0xea   :  { %v2122_v17 = vadd.f32 %v2075_v52, %v376_v16  ;;  %v2132_v23 = vpop.f32.mrf.mxu0 }
  0xeb   :  { %v1366_v19 = vpop.f32.mrf.mxu1 }
  0xec   :  { %1454 = vmatmul.mubr.f32.gmra.mxu0 %v2122_v17  ;;  %v1290_v25 = vpop.f32.mrf.mxu0 }
  0xed   :  { %v381_v21 = vpop.f32.mrf.mxu1  ;;  %1456 = vmatprep.mubr.msk.f32.mxu0 %vm1698_vm0, %v1697_v0 }
  0xee   :  { %v2130_v22 = vadd.f32 %v2075_v52, %v381_v21  ;;  %v2140_v28 = vpop.f32.mrf.mxu0 }
  0xef   :  { %v1369_v24 = vpop.f32.mrf.mxu1 }
  0xf0   :  { %1457 = vmatmul.mubr.f32.gmra.mxu0 %v2130_v22  ;;  %v1293_v30 = vpop.f32.mrf.mxu0 }
  0xf1   :  { %v386_v26 = vpop.f32.mrf.mxu1  ;;  %1459 = vmatprep.mubr.msk.f32.mxu0 %vm1698_vm0, %v1697_v0 }
  0xf2   :  { %v2138_v27 = vadd.f32 %v2075_v52, %v386_v26  ;;  %v2148_v33 = vpop.f32.mrf.mxu0 }
  0xf3   :  { %v1372_v29 = vpop.f32.mrf.mxu1 }
  0xf4   :  { %1460 = vmatmul.mubr.f32.gmra.mxu0 %v2138_v27  ;;  %v1296_v35 = vpop.f32.mrf.mxu0 }
  0xf5   :  { %v391_v31 = vpop.f32.mrf.mxu1  ;;  %1462 = vmatprep.mubr.msk.f32.mxu0 %vm1698_vm0, %v1697_v0 }
  0xf6   :  { %v2146_v32 = vadd.f32 %v2075_v52, %v391_v31  ;;  %v2156_v38 = vpop.f32.mrf.mxu0 }
  0xf7   :  { %v1375_v34 = vpop.f32.mrf.mxu1 }
  0xf8   :  { %1463 = vmatmul.mubr.f32.gmra.mxu0 %v2146_v32  ;;  %v1299_v40 = vpop.f32.mrf.mxu0 }
  0xf9   :  { %v396_v36 = vpop.f32.mrf.mxu1  ;;  %1465 = vmatprep.mubr.msk.f32.mxu0 %vm1698_vm0, %v1697_v0 }
  0xfa   :  { %v2154_v37 = vadd.f32 %v2075_v52, %v396_v36  ;;  %v2164_v43 = vpop.f32.mrf.mxu0 }
  0xfb   :  { %v1378_v39 = vpop.f32.mrf.mxu1 }
  0xfc   :  { %1466 = vmatmul.mubr.f32.gmra.mxu0 %v2154_v37  ;;  %v1302_v45 = vpop.f32.mrf.mxu0 }
  0xfd   :  { %v401_v41 = vpop.f32.mrf.mxu1  ;;  %1468 = vmatprep.mubr.msk.f32.mxu0 %vm1698_vm0, %v1697_v0 }
  0xfe   :  { %v2162_v42 = vadd.f32 %v2075_v52, %v401_v41  ;;  %v2172_v48 = vpop.f32.mrf.mxu0 }
  0xff   :  { %v1381_v44 = vpop.f32.mrf.mxu1 }
 0x100   :  { %1469 = vmatmul.mubr.f32.gmra.mxu0 %v2162_v42  ;;  %v1305_v50 = vpop.f32.mrf.mxu0 }
 0x101   :  { %v406_v46 = vpop.f32.mrf.mxu1  ;;  %1471 = vmatprep.mubr.msk.f32.mxu0 %vm1698_vm0, %v1697_v0 }
 0x102   :  { %v2170_v47 = vadd.f32 %v2075_v52, %v406_v46  ;;  %v2180_v55 = vpop.f32.mrf.mxu0 }
 0x103   :  { %v1384_v49 = vpop.f32.mrf.mxu1 }
 0x104   :  { %1472 = vmatmul.mubr.f32.gmra.mxu0 %v2170_v47  ;;  %v1308_v58 = vpop.f32.mrf.mxu0 }
 0x105   :  { %v411_v51 = vpop.f32.mrf.mxu1  ;;  %1474 = vmatprep.mubr.msk.f32.mxu0 %vm1698_vm0, %v1697_v0 }
 0x106   :  { %v2178_v53 = vadd.f32 %v2075_v52, %v411_v51  ;;  %v2188_v63 = vpop.f32.mrf.mxu0 }
 0x107   :  { %v1387_v56 = vpop.f32.mrf.mxu1 }
 0x108   :  { %1475 = vmatmul.mubr.f32.gmra.mxu0 %v2178_v53  ;;  %v1311_v4 = vpop.f32.mrf.mxu0 }
 0x109   :  { %v416_v59 = vpop.f32.mrf.mxu1  ;;  %1477 = vmatprep.mubr.msk.f32.mxu0 %vm1698_vm0, %v1697_v0 }
 0x10a   :  { %v2186_v62 = vadd.f32 %v2075_v52, %v416_v59  ;;  %v2196_v9 = vpop.f32.mrf.mxu0 }
 0x10b   :  { %v1390_v1 = vpop.f32.mrf.mxu1 }
 0x10c   :  { %1478 = vmatmul.mubr.f32.gmra.mxu0 %v2186_v62  ;;  %v1314_v11 = vpop.f32.mrf.mxu0 }
 0x10d   :  { %v421_v5 = vpop.f32.mrf.mxu1  ;;  %1480 = vmatprep.mubr.msk.f32.mxu0 %vm1698_vm0, %v1697_v0 }
 0x10e   :  { %v2194_v6 = vadd.f32 %v2075_v52, %v421_v5  ;;  %v2204_v16 = vpop.f32.mrf.mxu0 }
 0x10f   :  { %v1393_v10 = vpop.f32.mrf.mxu1 }
 0x110   :  { %1481 = vmatmul.mubr.f32.gmra.mxu0 %v2194_v6  ;;  %v1317_v20 = vpop.f32.mrf.mxu0 }
 0x111   :  { %v426_v14 = vpop.f32.mrf.mxu1  ;;  %1483 = vmatprep.mubr.msk.f32.mxu0 %vm1698_vm0, %v1697_v0 }
 0x112   :  { %v2202_v15 = vadd.f32 %v2075_v52, %v426_v14  ;;  %v2212_v25 = vpop.f32.mrf.mxu0 }
 0x113   :  { %v1396_v19 = vpop.f32.mrf.mxu1 }
 0x114   :  { %1484 = vmatmul.mubr.f32.gmra.mxu0 %v2202_v15  ;;  %v1320_v29 = vpop.f32.mrf.mxu0 }
 0x115   :  { %v431_v21 = vpop.f32.mrf.mxu1  ;;  %1486 = vmatprep.mubr.msk.f32.mxu0 %vm1698_vm0, %v1697_v0 }
 0x116   :  { %v2210_v24 = vadd.f32 %v2075_v52, %v431_v21  ;;  %v2220_v34 = vpop.f32.mrf.mxu0 }
 0x117   :  { %v1399_v26 = vpop.f32.mrf.mxu1 }
 0x118   :  { %1487 = vmatmul.mubr.f32.gmra.mxu0 %v2210_v24  ;;  %v1323_v36 = vpop.f32.mrf.mxu0 }
 0x119   :  { %v436_v30 = vpop.f32.mrf.mxu1  ;;  %1489 = vmatprep.mubr.msk.f32.mxu0 %vm1698_vm0, %v1697_v0 }
 0x11a   :  { %v2218_v31 = vadd.f32 %v2075_v52, %v436_v30  ;;  %v2223_v39 = vpop.f32.mrf.mxu0 }
 0x11b   :  { %v1402_v35 = vpop.f32.mrf.mxu1 }
 0x11c   :  { %1490 = vmatmul.mubr.f32.gmra.mxu0 %v2218_v31  ;;  %v1326_v40 = vpop.f32.mrf.mxu0 }
 0x11e   :  { %v2225_v41 = vpop.f32.mrf.mxu0 }
 0x120   :  { %v1329_v44 = vpop.f32.mrf.mxu0 }
 0x194   :  { %v522_v45 = vpop.f32.mrf.mxu0 }
 0x195   :  { %v2228_v46 = vsub.f32 %v2078_v54, %v522_v45 }
 0x196   :  { %v1437_v49 = vpop.f32.mrf.mxu0 }
 0x197   :  { %v635_v52 = vmul.f32 %v2228_v46, %v2228_v46 }
 0x198   :  { %v527_v50 = vpop.f32.mrf.mxu0 }
 0x199   :  { %v2233_v51 = vsub.f32 %v2084_v57, %v527_v50  ;;  %1525 = vmatmul.mubr.f32.vlgmr.msra.gmra.mxu1 %v635_v52 }
 0x19a   :  { %v1440_v56 = vpop.f32.mrf.mxu0  ;;  %1527 = vmatprep.mubr.msk.f32.mxu1 %vm1698_vm0, %v1697_v0 }
 0x19b   :  { %v636_v58 = vmul.f32 %v2233_v51, %v2233_v51 }
 0x19c   :  { %v532_v59 = vpop.f32.mrf.mxu0 }
 0x19d   :  { %v2240_v54 = vsub.f32 %v2090_v60, %v532_v59  ;;  %1528 = vmatmul.mubr.f32.gmra.mxu1 %v636_v58 }
 0x19e   :  { %v1443_v1 = vpop.f32.mrf.mxu0  ;;  %1530 = vmatprep.mubr.msk.f32.mxu1 %vm1698_vm0, %v1697_v0 }
 0x19f   :  { %v637_v57 = vmul.f32 %v2240_v54, %v2240_v54 }
 0x1a0   :  { %v537_v4 = vpop.f32.mrf.mxu0 }
 0x1a1   :  { %v2247_v5 = vsub.f32 %v2098_v2, %v537_v4  ;;  %1531 = vmatmul.mubr.f32.gmra.mxu1 %v637_v57 }
 0x1a2   :  { %v1446_v10 = vpop.f32.mrf.mxu0  ;;  %1533 = vmatprep.mubr.msk.f32.mxu1 %vm1698_vm0, %v1697_v0 }
 0x1a3   :  { %v638_v60 = vmul.f32 %v2247_v5, %v2247_v5 }
 0x1a4   :  { %v542_v11 = vpop.f32.mrf.mxu0 }
 0x1a5   :  { %v2254_v14 = vsub.f32 %v2106_v7, %v542_v11  ;;  %1534 = vmatmul.mubr.f32.gmra.mxu1 %v638_v60 }
 0x1a6   :  { %v1449_v19 = vpop.f32.mrf.mxu0  ;;  %1536 = vmatprep.mubr.msk.f32.mxu1 %vm1698_vm0, %v1697_v0 }
 0x1a7   :  { %v639_v2 = vmul.f32 %v2254_v14, %v2254_v14 }
 0x1a8   :  { %v547_v20 = vpop.f32.mrf.mxu0 }
 0x1a9   :  { %v2261_v21 = vsub.f32 %v2114_v12, %v547_v20  ;;  %1537 = vmatmul.mubr.f32.gmra.mxu1 %v639_v2 }
 0x1aa   :  { %v1452_v26 = vpop.f32.mrf.mxu0  ;;  %1539 = vmatprep.mubr.msk.f32.mxu1 %vm1698_vm0, %v1697_v0 }
 0x1ab   :  { %v640_v7 = vmul.f32 %v2261_v21, %v2261_v21 }
 0x1ac   :  { %v552_v29 = vpop.f32.mrf.mxu0 }
 0x1ad   :  { %v2268_v30 = vsub.f32 %v2122_v17, %v552_v29  ;;  %1540 = vmatmul.mubr.f32.gmra.mxu1 %v640_v7 }
 0x1ae   :  { %v1455_v35 = vpop.f32.mrf.mxu0  ;;  %1542 = vmatprep.mubr.msk.f32.mxu1 %vm1698_vm0, %v1697_v0 }
 0x1af   :  { %v641_v12 = vmul.f32 %v2268_v30, %v2268_v30 }
 0x1b0   :  { %v557_v36 = vpop.f32.mrf.mxu0 }
 0x1b1   :  { %v2275_v40 = vsub.f32 %v2130_v22, %v557_v36  ;;  %1543 = vmatmul.mubr.f32.gmra.mxu1 %v641_v12 }
 0x1b2   :  { %v1458_v44 = vpop.f32.mrf.mxu0  ;;  %1545 = vmatprep.mubr.msk.f32.mxu1 %vm1698_vm0, %v1697_v0 }
 0x1b3   :  { %v642_v17 = vmul.f32 %v2275_v40, %v2275_v40 }
 0x1b4   :  { %v562_v45 = vpop.f32.mrf.mxu0 }
 0x1b5   :  { %v2282_v49 = vsub.f32 %v2138_v27, %v562_v45  ;;  %1546 = vmatmul.mubr.f32.gmra.mxu1 %v642_v17 }
 0x1b6   :  { %v1461_v52 = vpop.f32.mrf.mxu0  ;;  %1548 = vmatprep.mubr.msk.f32.mxu1 %vm1698_vm0, %v1697_v0 }
 0x1b7   :  { %v643_v22 = vmul.f32 %v2282_v49, %v2282_v49 }
 0x1b8   :  { %v567_v50 = vpop.f32.mrf.mxu0 }
 0x1b9   :  { %v2289_v56 = vsub.f32 %v2146_v32, %v567_v50  ;;  %1549 = vmatmul.mubr.f32.gmra.mxu1 %v643_v22 }
 0x1ba   :  { %v1464_v58 = vpop.f32.mrf.mxu0  ;;  %1551 = vmatprep.mubr.msk.f32.mxu1 %vm1698_vm0, %v1697_v0 }
 0x1bb   :  { %v644_v27 = vmul.f32 %v2289_v56, %v2289_v56 }
 0x1bc   :  { %v572_v59 = vpop.f32.mrf.mxu0 }
 0x1bd   :  { %v2296_v1 = vsub.f32 %v2154_v37, %v572_v59  ;;  %1552 = vmatmul.mubr.f32.gmra.mxu1 %v644_v27 }
 0x1be   :  { %v1467_v57 = vpop.f32.mrf.mxu0  ;;  %1554 = vmatprep.mubr.msk.f32.mxu1 %vm1698_vm0, %v1697_v0 }
 0x1bf   :  { %v645_v32 = vmul.f32 %v2296_v1, %v2296_v1 }
 0x1c0   :  { %v577_v4 = vpop.f32.mrf.mxu0 }
 0x1c1   :  { %v2303_v10 = vsub.f32 %v2162_v42, %v577_v4  ;;  %1555 = vmatmul.mubr.f32.gmra.mxu1 %v645_v32 }
 0x1c2   :  { %v1470_v60 = vpop.f32.mrf.mxu0  ;;  %1557 = vmatprep.mubr.msk.f32.mxu1 %vm1698_vm0, %v1697_v0 }
 0x1c3   :  { %v646_v37 = vmul.f32 %v2303_v10, %v2303_v10 }
 0x1c4   :  { %v582_v11 = vpop.f32.mrf.mxu0 }
 0x1c5   :  { %v2310_v19 = vsub.f32 %v2170_v47, %v582_v11  ;;  %1558 = vmatmul.mubr.f32.gmra.mxu1 %v646_v37 }
 0x1c6   :  { %v1473_v2 = vpop.f32.mrf.mxu0  ;;  %1560 = vmatprep.mubr.msk.f32.mxu1 %vm1698_vm0, %v1697_v0 }
 0x1c7   :  { %v647_v42 = vmul.f32 %v2310_v19, %v2310_v19 }
 0x1c8   :  { %v587_v20 = vpop.f32.mrf.mxu0 }
 0x1c9   :  { %v2317_v26 = vsub.f32 %v2178_v53, %v587_v20  ;;  %1561 = vmatmul.mubr.f32.gmra.mxu1 %v647_v42 }
 0x1ca   :  { %v1476_v7 = vpop.f32.mrf.mxu0  ;;  %1563 = vmatprep.mubr.msk.f32.mxu1 %vm1698_vm0, %v1697_v0 }
 0x1cb   :  { %v648_v47 = vmul.f32 %v2317_v26, %v2317_v26 }
 0x1cc   :  { %v592_v29 = vpop.f32.mrf.mxu0 }
 0x1cd   :  { %v2324_v35 = vsub.f32 %v2186_v62, %v592_v29  ;;  %1564 = vmatmul.mubr.f32.gmra.mxu1 %v648_v47 }
 0x1ce   :  { %v1479_v12 = vpop.f32.mrf.mxu0  ;;  %1566 = vmatprep.mubr.msk.f32.mxu1 %vm1698_vm0, %v1697_v0 }
 0x1cf   :  { %v649_v53 = vmul.f32 %v2324_v35, %v2324_v35 }
 0x1d0   :  { %v597_v36 = vpop.f32.mrf.mxu0 }
 0x1d1   :  { %v2331_v44 = vsub.f32 %v2194_v6, %v597_v36  ;;  %1567 = vmatmul.mubr.f32.gmra.mxu1 %v649_v53  ;;  %v2361_v53 = vld [vmem:[%s2569_s3 + $0x1] ss:$0 sm:$0xff] }
 0x1d2   :  { %v1482_v17 = vpop.f32.mrf.mxu0  ;;  %1569 = vmatprep.mubr.msk.f32.mxu1 %vm1698_vm0, %v1697_v0 }
 0x1d3   :  { %v650_v62 = vmul.f32 %v2331_v44, %v2331_v44 }
 0x1d4   :  { %v602_v45 = vpop.f32.mrf.mxu0 }
 0x1d5   :  { %v2338_v52 = vsub.f32 %v2202_v15, %v602_v45  ;;  %1570 = vmatmul.mubr.f32.gmra.mxu1 %v650_v62  ;;  %v2367_v45 = vld [vmem:[%s2569_s3 + $0x2] ss:$0 sm:$0xff] }
 0x1d6   :  { %v1485_v22 = vpop.f32.mrf.mxu0  ;;  %1572 = vmatprep.mubr.msk.f32.mxu1 %vm1698_vm0, %v1697_v0 }
 0x1d7   :  { %v651_v6 = vmul.f32 %v2338_v52, %v2338_v52 }
 0x1d8   :  { %v607_v50 = vpop.f32.mrf.mxu0 }
 0x1d9   :  { %v2345_v58 = vsub.f32 %v2210_v24, %v607_v50  ;;  %1573 = vmatmul.mubr.f32.gmra.mxu1 %v651_v6 }
 0x1da   :  { %v1488_v27 = vpop.f32.mrf.mxu0  ;;  %1575 = vmatprep.mubr.msk.f32.mxu1 %vm1698_vm0, %v1697_v0 }
 0x1db   :  { %v652_v15 = vmul.f32 %v2345_v58, %v2345_v58 }
 0x1dc   :  { %v612_v59 = vpop.f32.mrf.mxu0 }
 0x1dd   :  { %v2352_v57 = vsub.f32 %v2218_v31, %v612_v59  ;;  %1576 = vmatmul.mubr.f32.gmra.mxu1 %v652_v15 }
 0x1de   :  { %v1491_v32 = vpop.f32.mrf.mxu0  ;;  %1578 = vmatprep.mubr.msk.f32.mxu1 %vm1698_vm0, %v1697_v0 }
 0x1df   :  { %v653_v24 = vmul.f32 %v2352_v57, %v2352_v57 }
 0x1e1   :  { %1579 = vmatmul.mubr.f32.gmra.mxu1 %v653_v24 }
 0x259   :  { %v720_v4 = vpop.f32.mrf.mxu1 }
 0x25a   :  { %v721_v60 = vadd.f32 1e-05, %v720_v4 }
 0x25b   :  { %v1526_v37 = vpop.f32.mrf.mxu1 }
 0x25c   :  { %1583 = vrsqrt.f32 %v721_v60 }
 0x25d   :  { %v725_v11 = vpop.f32.mrf.mxu1 }
 0x25e   :  { %v726_v2 = vadd.f32 1e-05, %v725_v11 }
 0x25f   :  { %v1529_v42 = vpop.f32.mrf.mxu1 }
 0x260   :  { %1585 = vrsqrt.f32 %v726_v2 }
 0x261   :  { %v730_v20 = vpop.f32.mrf.mxu1 }
 0x262   :  { %v731_v31 = vadd.f32 1e-05, %v730_v20 }
 0x263   :  { %v1532_v7 = vpop.f32.mrf.mxu1 }
 0x264   :  { %1587 = vrsqrt.f32 %v731_v31 }
 0x265   :  { %v735_v47 = vpop.f32.mrf.mxu1 }
 0x266   :  { %v736_v29 = vadd.f32 1e-05, %v735_v47 }
 0x267   :  { %v1535_v12 = vpop.f32.mrf.mxu1 }
 0x268   :  { %1589 = vrsqrt.f32 %v736_v29 }
 0x269   :  { %v1584_v0 = vpop.eup %1583  ;;  %v740_v36 = vpop.f32.mrf.mxu1 }
 0x26a   :  { %v833_v17 = vmul.f32 %v1584_v0, %v2228_v46  ;;  %v741_v62 = vadd.f32 1e-05, %v740_v36 }
 0x26b   :  { %v1538_v22 = vpop.f32.mrf.mxu1 }
 0x26c   :  { %v856_v6 = vmul.f32 %v2361_v53, %v833_v17  ;;  %1591 = vrsqrt.f32 %v741_v62 }
 0x26d   :  { %v1586_v50 = vpop.eup %1585  ;;  %v745_v27 = vpop.f32.mrf.mxu1 }
 0x26e   :  { %v879_v15 = vadd.f32 %v2367_v45, %v856_v6  ;;  %v834_v59 = vmul.f32 %v1586_v50, %v2233_v51  ;;  %v746_v32 = vadd.f32 1e-05, %v745_v27 }
 0x26f   :  { %v1541_v24 = vpop.f32.mrf.mxu1 }
 0x270   :  { %v2373_v46 = vadd.f32 %v879_v15, %v2092_v61  ;;  %v857_v4 = vmul.f32 %v2361_v53, %v834_v59  ;;  %1593 = vrsqrt.f32 %v746_v32 }
 0x271   :  { %v1588_v60 = vpop.eup %1587  ;;  %v750_v37 = vpop.f32.mrf.mxu1 }
 0x272   :  { %v1114_v11 = vmul.f32 -1.442695, %v2373_v46  ;;  %v880_v2 = vadd.f32 %v2367_v45, %v857_v4  ;;  %v835_v42 = vmul.f32 %v1588_v60, %v2240_v54  ;;  %v751_v20 = vadd.f32 1e-05, %v750_v37 }
 0x273   :  { %v1544_v31 = vpop.f32.mrf.mxu1 }
 0x274   :  { %1595 = vpow2.f32 %v1114_v11  ;;  %v2380_v51 = vadd.f32 %v880_v2, %v2100_v3  ;;  %v858_v61 = vmul.f32 %v2361_v53, %v835_v42 }
 0x275   :  { %v1590_v7 = vpop.eup %1589  ;;  %1597 = vrsqrt.f32 %v751_v20  ;;  %v755_v47 = vpop.f32.mrf.mxu1 }
 0x276   :  { %v1115_v29 = vmul.f32 -1.442695, %v2380_v51  ;;  %v881_v12 = vadd.f32 %v2367_v45, %v858_v61  ;;  %v836_v0 = vmul.f32 %v1590_v7, %v2247_v5  ;;  %v756_v36 = vadd.f32 1e-05, %v755_v47 }
 0x277   :  { %v1547_v17 = vpop.f32.mrf.mxu1 }
 0x278   :  { %1599 = vpow2.f32 %v1115_v29  ;;  %v2387_v54 = vadd.f32 %v881_v12, %v2108_v8  ;;  %v859_v3 = vmul.f32 %v2361_v53, %v836_v0 }
 0x279   :  { %v1592_v62 = vpop.eup %1591  ;;  %1601 = vrsqrt.f32 %v756_v36  ;;  %v760_v22 = vpop.f32.mrf.mxu1 }
 0x27a   :  { %v1116_v6 = vmul.f32 -1.442695, %v2387_v54  ;;  %v882_v50 = vadd.f32 %v2367_v45, %v859_v3  ;;  %v837_v27 = vmul.f32 %v1592_v62, %v2254_v14  ;;  %v761_v15 = vadd.f32 1e-05, %v760_v22 }
 0x27b   :  { %v1550_v59 = vpop.f32.mrf.mxu1 }
 0x27c   :  { %1603 = vpow2.f32 %v1116_v6  ;;  %v2394_v5 = vadd.f32 %v882_v50, %v2116_v13  ;;  %v860_v8 = vmul.f32 %v2361_v53, %v837_v27 }
 0x27d   :  { %v1594_v32 = vpop.eup %1593  ;;  %1605 = vrsqrt.f32 %v761_v15  ;;  %v765_v24 = vpop.f32.mrf.mxu1 }
 0x27e   :  { %v1117_v4 = vmul.f32 -1.442695, %v2394_v5  ;;  %v883_v60 = vadd.f32 %v2367_v45, %v860_v8  ;;  %v838_v37 = vmul.f32 %v1594_v32, %v2261_v21  ;;  %v766_v11 = vadd.f32 1e-05, %v765_v24 }
 0x27f   :  { %v1553_v2 = vpop.f32.mrf.mxu1 }
 0x280   :  { %1607 = vpow2.f32 %v1117_v4  ;;  %v2401_v14 = vadd.f32 %v883_v60, %v2124_v18  ;;  %v861_v13 = vmul.f32 %v2361_v53, %v838_v37 }
 0x281   :  { %v1596_v42 = vpop.eup %1595  ;;  %1609 = vrsqrt.f32 %v766_v11  ;;  %v770_v20 = vpop.f32.mrf.mxu1 }
 0x282   :  { %v1598_v31 = vpop.eup %1597  ;;  %v974_v61 = vadd.f32 1.0, %v1596_v42  ;;  %v1118_v7 = vmul.f32 -1.442695, %v2401_v14  ;;  %v884_v47 = vadd.f32 %v2367_v45, %v861_v13  ;;  %v771_v29 = vadd.f32 1e-05, %v770_v20 }
 0x283   :  { %v839_v21 = vmul.f32 %v1598_v31, %v2268_v30  ;;  %v1556_v12 = vpop.f32.mrf.mxu1 }
 0x284   :  { %1611 = vrcp.f32 %v974_v61  ;;  %v2408_v0 = vadd.f32 %v884_v47, %v2132_v23 }
 0x285   :  { %v1600_v18 = vpop.eup %1599  ;;  %1613 = vpow2.f32 %v1118_v7  ;;  %v862_v36 = vmul.f32 %v2361_v53, %v839_v21  ;;  %v775_v17 = vpop.f32.mrf.mxu1 }
 0x286   :  { %v1602_v3 = vpop.eup %1601  ;;  %v975_v62 = vadd.f32 1.0, %v1600_v18  ;;  %v1119_v22 = vmul.f32 -1.442695, %v2408_v0  ;;  %1615 = vrsqrt.f32 %v771_v29  ;;  %v776_v6 = vadd.f32 1e-05, %v775_v17 }
 0x287   :  { %v885_v50 = vadd.f32 %v2367_v45, %v862_v36  ;;  %v840_v30 = vmul.f32 %v1602_v3, %v2275_v40  ;;  %v1559_v27 = vpop.f32.mrf.mxu1 }
 0x288   :  { %1617 = vrcp.f32 %v975_v62 }
 0x289   :  { %v1604_v15 = vpop.eup %1603  ;;  %1619 = vpow2.f32 %v1119_v22  ;;  %v2415_v23 = vadd.f32 %v885_v50, %v2140_v28  ;;  %v863_v59 = vmul.f32 %v2361_v53, %v840_v30  ;;  %v780_v8 = vpop.f32.mrf.mxu1 }
 0x28a   :  { %v1606_v32 = vpop.eup %1605  ;;  %v976_v24 = vadd.f32 1.0, %v1604_v15  ;;  %1621 = vrsqrt.f32 %v776_v6  ;;  %v781_v4 = vadd.f32 1e-05, %v780_v8 }
 0x28b   :  { %v1120_v60 = vmul.f32 -1.442695, %v2415_v23  ;;  %v886_v37 = vadd.f32 %v2367_v45, %v863_v59  ;;  %v841_v40 = vmul.f32 %v1606_v32, %v2282_v49  ;;  %v1562_v11 = vpop.f32.mrf.mxu1 }
 0x28c   :  { %1623 = vrcp.f32 %v976_v24 }
 0x28d   :  { %v1608_v2 = vpop.eup %1607  ;;  %1625 = vpow2.f32 %v1120_v60  ;;  %v2422_v28 = vadd.f32 %v886_v37, %v2148_v33  ;;  %v864_v13 = vmul.f32 %v2361_v53, %v841_v40  ;;  %v785_v42 = vpop.f32.mrf.mxu1 }
 0x28e   :  { %v1610_v20 = vpop.eup %1609  ;;  %v977_v31 = vadd.f32 1.0, %v1608_v2  ;;  %1627 = vrsqrt.f32 %v781_v4  ;;  %v786_v61 = vadd.f32 1e-05, %v785_v42 }
 0x28f   :  { %v1121_v7 = vmul.f32 -1.442695, %v2422_v28  ;;  %v887_v47 = vadd.f32 %v2367_v45, %v864_v13  ;;  %v842_v49 = vmul.f32 %v1610_v20, %v2289_v56  ;;  %v1565_v29 = vpop.f32.mrf.mxu1 }
 0x290   :  { %1629 = vrcp.f32 %v977_v31 }
 0x291   :  { %v1612_v21 = vpop.eup %1611  ;;  %1631 = vpow2.f32 %v1121_v7  ;;  %v2429_v33 = vadd.f32 %v887_v47, %v2156_v38  ;;  %v865_v12 = vmul.f32 %v2361_v53, %v842_v49  ;;  %v790_v18 = vpop.f32.mrf.mxu1 }
 0x292   :  { %v1614_v36 = vpop.eup %1613  ;;  %v1031_v17 = vmul.f32 %v1612_v21, %v2373_v46  ;;  %1633 = vrsqrt.f32 %v786_v61  ;;  %v791_v3 = vadd.f32 1e-05, %v790_v18 }
 0x293   :  { %v1616_v62 = vpop.eup %1615  ;;  %v978_v22 = vadd.f32 1.0, %v1614_v36  ;;  %v1122_v6 = vmul.f32 -1.442695, %v2429_v33  ;;  %v888_v56 = vadd.f32 %v2367_v45, %v865_v12  ;;  %v1568_v50 = vpop.f32.mrf.mxu1 }
 0x294   :  { %1050 = vst [vmem:[%s2570_s5] sm:$0xff] %v1031_v17  ;;  %v843_v38 = vmul.f32 %v1616_v62, %v2296_v1  ;;  %1635 = vrsqrt.f32 %v791_v3 }
 0x295   :  { %v1618_v30 = vpop.eup %1617  ;;  %1637 = vrcp.f32 %v978_v22  ;;  %v2440_v46 = vadd.f32 %v888_v56, %v2164_v43  ;;  %v795_v27 = vpop.f32.mrf.mxu1 }
 0x296   :  { %v1620_v15 = vpop.eup %1619  ;;  %v1032_v59 = vmul.f32 %v1618_v30, %v2380_v51  ;;  %1639 = vpow2.f32 %v1122_v6  ;;  %v866_v8 = vmul.f32 %v2361_v53, %v843_v38  ;;  %v796_v32 = vadd.f32 1e-05, %v795_v27 }
 0x297   :  { %v1622_v24 = vpop.eup %1621  ;;  %v979_v4 = vadd.f32 1.0, %v1620_v15  ;;  %v1123_v60 = vmul.f32 -1.442695, %v2440_v46  ;;  %v1571_v37 = vpop.f32.mrf.mxu1 }
 0x298   :  { %1051 = vst [vmem:[%s2570_s5 + $0x8] sm:$0xff] %v1032_v59  ;;  %v889_v43 = vadd.f32 %v2367_v45, %v866_v8  ;;  %v844_v1 = vmul.f32 %v1622_v24, %v2303_v10  ;;  %1641 = vrsqrt.f32 %v796_v32 }
 0x299   :  { %v1624_v40 = vpop.eup %1623  ;;  %1643 = vrcp.f32 %v979_v4  ;;  %v800_v51 = vpop.f32.mrf.mxu1 }
 0x29a   :  { %v1626_v11 = vpop.eup %1625  ;;  %v1033_v2 = vmul.f32 %v1624_v40, %v2387_v54  ;;  %1645 = vpow2.f32 %v1123_v60  ;;  %v2452_v13 = vadd.f32 %v889_v43, %v2172_v48  ;;  %v867_v42 = vmul.f32 %v2361_v53, %v844_v1 }
 0x29b   :  { %v1628_v20 = vpop.eup %1627  ;;  %v980_v31 = vadd.f32 1.0, %v1626_v11  ;;  %v801_v61 = vadd.f32 1e-05, %v800_v51  ;;  %v1574_v7 = vpop.f32.mrf.mxu1 }
 0x29c   :  { %1052 = vst [vmem:[%s2570_s5 + $0x10] sm:$0xff] %v1033_v2  ;;  %v1124_v10 = vmul.f32 -1.442695, %v2452_v13  ;;  %v890_v47 = vadd.f32 %v2367_v45, %v867_v42  ;;  %v845_v54 = vmul.f32 %v1628_v20, %v2310_v19 }
 0x29d   :  { %v1630_v49 = vpop.eup %1629  ;;  %1647 = vrcp.f32 %v980_v31  ;;  %v805_v48 = vpop.f32.mrf.mxu1 }
 0x29e   :  { %v1632_v29 = vpop.eup %1631  ;;  %v1034_v21 = vmul.f32 %v1630_v49, %v2394_v5  ;;  %1649 = vpow2.f32 %v1124_v10  ;;  %v2463_v12 = vadd.f32 %v890_v47, %v2180_v55  ;;  %v868_v18 = vmul.f32 %v2361_v53, %v845_v54 }
 0x29f   :  { %v1634_v36 = vpop.eup %1633  ;;  %v981_v17 = vadd.f32 1.0, %v1632_v29  ;;  %1651 = vrsqrt.f32 %v801_v61  ;;  %v806_v3 = vadd.f32 1e-05, %v805_v48  ;;  %v1577_v62 = vpop.f32.mrf.mxu1 }
 0x2a0   :  { %1053 = vst [vmem:[%s2570_s5 + $0x18] sm:$0xff] %v1034_v21  ;;  %v1125_v19 = vmul.f32 -1.442695, %v2463_v12  ;;  %v891_v22 = vadd.f32 %v2367_v45, %v868_v18  ;;  %v846_v5 = vmul.f32 %v1634_v36, %v2317_v26 }
 0x2a1   :  { %v1636_v6 = vpop.eup %1635  ;;  %1653 = vrcp.f32 %v981_v17  ;;  %v810_v55 = vpop.f32.mrf.mxu1 }
 0x2a2   :  { %v1638_v56 = vpop.eup %1637  ;;  %1655 = vpow2.f32 %v1125_v19  ;;  %v2473_v50 = vadd.f32 %v891_v22, %v2188_v63  ;;  %v869_v38 = vmul.f32 %v2361_v53, %v846_v5  ;;  %v847_v30 = vmul.f32 %v1636_v6, %v2324_v35 }
 0x2a3   :  { %v1640_v27 = vpop.eup %1639  ;;  %v1035_v15 = vmul.f32 %v1638_v56, %v2401_v14  ;;  %1657 = vrsqrt.f32 %v806_v3  ;;  %v811_v59 = vadd.f32 1e-05, %v810_v55  ;;  %v1580_v8 = vpop.f32.mrf.mxu1 }
 0x2a4   :  { %v982_v32 = vadd.f32 1.0, %v1640_v27  ;;  %v1126_v26 = vmul.f32 -1.442695, %v2473_v50  ;;  %v892_v24 = vadd.f32 %v2367_v45, %v869_v38  ;;  %v870_v4 = vmul.f32 %v2361_v53, %v847_v30 }
 0x2a5   :  { %v1642_v60 = vpop.eup %1641  ;;  %1054 = vst [vmem:[%s2570_s5 + $0x20] sm:$0xff] %v1035_v15  ;;  %1659 = vrsqrt.f32 %v811_v59 }
 0x2a6   :  { %v1644_v63 = vpop.eup %1643  ;;  %1661 = vrcp.f32 %v982_v32  ;;  %v2485_v35 = vadd.f32 %v892_v24, %v2196_v9  ;;  %v893_v14 = vadd.f32 %v2367_v45, %v870_v4  ;;  %v848_v37 = vmul.f32 %v1642_v60, %v2331_v44 }
 0x2a7   :  { %v1646_v43 = vpop.eup %1645  ;;  %v1036_v1 = vmul.f32 %v1644_v63, %v2408_v0  ;;  %1663 = vpow2.f32 %v1126_v26 }
 0x2a8   :  { %v983_v40 = vadd.f32 1.0, %v1646_v43  ;;  %v1127_v51 = vmul.f32 -1.442695, %v2485_v35  ;;  %v2492_v11 = vadd.f32 %v893_v14, %v2204_v16  ;;  %v871_v2 = vmul.f32 %v2361_v53, %v848_v37 }
 0x2a9   :  { %1055 = vst [vmem:[%s2570_s5 + $0x28] sm:$0xff] %v1036_v1 }
 0x2aa   :  { %v1648_v9 = vpop.eup %1647  ;;  %1665 = vrcp.f32 %v983_v40  ;;  %v1128_v44 = vmul.f32 -1.442695, %v2492_v11  ;;  %v894_v42 = vadd.f32 %v2367_v45, %v871_v2 }
 0x2ab   :  { %v1650_v0 = vpop.eup %1649  ;;  %v1037_v20 = vmul.f32 %v1648_v9, %v2415_v23  ;;  %1667 = vpow2.f32 %v1127_v51 }
 0x2ac   :  { %v1652_v31 = vpop.eup %1651  ;;  %v984_v61 = vadd.f32 1.0, %v1650_v0  ;;  %1669 = vpow2.f32 %v1128_v44  ;;  %v2502_v16 = vadd.f32 %v894_v42, %v2212_v25 }
 0x2ad   :  { %1056 = vst [vmem:[%s2570_s5 + $0x30] sm:$0xff] %v1037_v20  ;;  %v849_v7 = vmul.f32 %v1652_v31, %v2338_v52 }
 0x2ae   :  { %v1654_v10 = vpop.eup %1653  ;;  %1671 = vrcp.f32 %v984_v61  ;;  %v1129_v47 = vmul.f32 -1.442695, %v2502_v16 }
 0x2af   :  { %v1656_v54 = vpop.eup %1655  ;;  %v1038_v23 = vmul.f32 %v1654_v10, %v2422_v28  ;;  %v872_v49 = vmul.f32 %v2361_v53, %v849_v7 }
 0x2b0   :  { %v1658_v48 = vpop.eup %1657  ;;  %v985_v29 = vadd.f32 1.0, %v1656_v54  ;;  %1673 = vpow2.f32 %v1129_v47 }
 0x2b1   :  { %1057 = vst [vmem:[%s2570_s5 + $0x38] sm:$0xff] %v1038_v23  ;;  %v895_v25 = vadd.f32 %v2367_v45, %v872_v49  ;;  %v850_v52 = vmul.f32 %v1658_v48, %v2345_v58 }
 0x2b2   :  { %v1660_v21 = vpop.eup %1659  ;;  %1675 = vrcp.f32 %v985_v29 }
 0x2b3   :  { %v1662_v18 = vpop.eup %1661  ;;  %v914_v36 = vadd.f32 %v895_v25, %v2220_v34  ;;  %v873_v28 = vmul.f32 %v2361_v53, %v850_v52  ;;  %v851_v17 = vmul.f32 %v1660_v21, %v2352_v57 }
 0x2b4   :  { %v1664_v3 = vpop.eup %1663  ;;  %v1039_v62 = vmul.f32 %v1662_v18, %v2429_v33 }
 0x2b5   :  { %v986_v19 = vadd.f32 1.0, %v1664_v3  ;;  %v1130_v22 = vmul.f32 -1.442695, %v914_v36  ;;  %v896_v5 = vadd.f32 %v2367_v45, %v873_v28  ;;  %v874_v6 = vmul.f32 %v2361_v53, %v851_v17 }
 0x2b6   :  { %1058 = vst [vmem:[%s2570_s5 + $0x40] sm:$0xff] %v1039_v62 }
 0x2b7   :  { %v1666_v58 = vpop.eup %1665  ;;  %1677 = vrcp.f32 %v986_v19  ;;  %v915_v34 = vadd.f32 %v896_v5, %v2223_v39  ;;  %v897_v55 = vadd.f32 %v2367_v45, %v874_v6 }
 0x2b8   :  { %v1668_v57 = vpop.eup %1667  ;;  %v1040_v56 = vmul.f32 %v1666_v58, %v2440_v46  ;;  %1679 = vpow2.f32 %v1130_v22 }
 0x2b9   :  { %v1670_v33 = vpop.eup %1669  ;;  %v987_v38 = vadd.f32 1.0, %v1668_v57  ;;  %v1131_v30 = vmul.f32 -1.442695, %v915_v34  ;;  %v916_v27 = vadd.f32 %v897_v55, %v2225_v41 }
 0x2ba   :  { %1059 = vst [vmem:[%s2570_s5 + $0x48] sm:$0xff] %v1040_v56  ;;  %v988_v53 = vadd.f32 1.0, %v1670_v33 }
 0x2bb   :  { %v1672_v15 = vpop.eup %1671  ;;  %1681 = vrcp.f32 %v987_v38  ;;  %v1132_v59 = vmul.f32 -1.442695, %v916_v27 }
 0x2bc   :  { %v1041_v39 = vmul.f32 %v1672_v15, %v2452_v13  ;;  %1683 = vrcp.f32 %v988_v53 }
 0x2bd   :  { %v1674_v45 = vpop.eup %1673  ;;  %1685 = vpow2.f32 %v1131_v30 }
 0x2be   :  { %1060 = vst [vmem:[%s2570_s5 + $0x50] sm:$0xff] %v1041_v39  ;;  %v989_v46 = vadd.f32 1.0, %v1674_v45  ;;  %1687 = vpow2.f32 %v1132_v59 }
 0x2bf   :  { %v1676_v41 = vpop.eup %1675 }
 0x2c0   :  { %v1042_v8 = vmul.f32 %v1676_v41, %v2463_v12  ;;  %1689 = vrcp.f32 %v989_v46 }
 0x2c2   :  { %1061 = vst [vmem:[%s2570_s5 + $0x58] sm:$0xff] %v1042_v8 }
 0x2c4   :  { %v1678_v32 = vpop.eup %1677 }
 0x2c5   :  { %v1680_v26 = vpop.eup %1679  ;;  %v1043_v13 = vmul.f32 %v1678_v32, %v2473_v50 }
 0x2c6   :  { %v990_v24 = vadd.f32 1.0, %v1680_v26 }
 0x2c7   :  { %1062 = vst [vmem:[%s2570_s5 + $0x60] sm:$0xff] %v1043_v13 }
 0x2c8   :  { %v1682_v4 = vpop.eup %1681  ;;  %1691 = vrcp.f32 %v990_v24 }
 0x2c9   :  { %v1684_v60 = vpop.eup %1683  ;;  %v1044_v63 = vmul.f32 %v1682_v4, %v2485_v35 }
 0x2ca   :  { %v1686_v12 = vpop.eup %1685  ;;  %v1045_v14 = vmul.f32 %v1684_v60, %v2492_v11 }
 0x2cb   :  { %v1688_v37 = vpop.eup %1687  ;;  %1063 = vst [vmem:[%s2570_s5 + $0x68] sm:$0xff] %v1044_v63  ;;  %v991_v43 = vadd.f32 1.0, %v1686_v12 }
 0x2cc   :  { %1064 = vst [vmem:[%s2570_s5 + $0x70] sm:$0xff] %v1045_v14  ;;  %v992_v50 = vadd.f32 1.0, %v1688_v37 }
 0x2cd   :  { %v1690_v1 = vpop.eup %1689  ;;  %1693 = vrcp.f32 %v991_v43 }
 0x2ce   :  { %v1046_v40 = vmul.f32 %v1690_v1, %v2502_v16  ;;  %1695 = vrcp.f32 %v992_v50 }
 0x2d0   :  { %1065 = vst [vmem:[%s2570_s5 + $0x78] sm:$0xff] %v1046_v40 }
 0x2d5   :  { %v1692_v35 = vpop.eup %1691 }
 0x2d6   :  { %v1047_v51 = vmul.f32 %v1692_v35, %v914_v36 }
 0x2d8   :  { %1066 = vst [vmem:[%s2570_s5 + $0x80] sm:$0xff] %v1047_v51 }
 0x2da   :  { %v1694_v11 = vpop.eup %1693 }
 0x2db   :  { %v1696_v2 = vpop.eup %1695  ;;  %v1048_v9 = vmul.f32 %v1694_v11, %v915_v34 }
 0x2dc   :  { %v1049_v44 = vmul.f32 %v1696_v2, %v916_v27 }
 0x2dd   :  { %1067 = vst [vmem:[%s2570_s5 + $0x88] sm:$0xff] %v1048_v9 }
 0x2de   :  { %1068 = vst [vmem:[%s2570_s5 + $0x90] sm:$0xff] %v1049_v44 }

</bundles_post_ra>
